<compile_context>
chip_gen: v5e
topology: v5e:2x2
jax: 0.10.0
libtpu: 0.0.40
codegen_flags: <defaults>
</compile_context>

<pallas_src>
import functools

import jax
import jax.numpy as jnp
from jax import lax
from jax.experimental import pallas as pl
from jax.experimental.pallas import tpu as pltpu

LANE = 128
MAX_BLOCK_ROWS = 2048  # 2048 x 128 f32 = 1 MiB tile; 2 MiB double-buffered


def _softplus_partial_kernel(x_ref, o_ref, *, block_rows, rem):
    # Stream in native dtype, compute in f32 (v5e has no bf16 VPU/EUP).
    x = x_ref[...].astype(jnp.float32)                      # (block_rows, LANE)

    # Numerically stable softplus: max(x, 0) + log1p(exp(-|x|)).
    sp = jnp.maximum(x, 0.0) + jnp.log1p(jnp.exp(-jnp.abs(x)))

    if rem != 0:
        # Only compiled when the row count does not divide block_rows: the
        # final grid step's out-of-bounds rows contain garbage and must be
        # zeroed.  All other steps use limit == block_rows (mask is all-true).
        i = pl.program_id(0)
        limit = jnp.where(i == pl.num_programs(0) - 1, rem, block_rows)
        row = lax.broadcasted_iota(jnp.int32, (block_rows, 1), 0)
        sp = jnp.where(row < limit, sp, 0.0)

    # Per-tile partial sum as a full (8, 128) vreg: splitting the sublane-major
    # axis in groups of 8 keeps the layout intact, and the axis-0 reduce is
    # pure VPU vreg adds (no XLU, no scalar accumulation on the critical path).
    o_ref[...] = sp.reshape(block_rows // 8, 8, LANE).sum(axis=0)


def oc_softmax_with_loss(inputs):
    """JAX/Pallas equivalent of OCSoftmaxWithLoss().forward(inputs)."""
    total = inputs.size
    flat = inputs.reshape(-1)  # row-major flatten; no dtype cast in the wrapper

    # Pad (only when misaligned) to a multiple of 8*128 with -inf, whose
    # softplus is exactly 0, so no in-kernel lane mask is ever needed.
    tile_align = 8 * LANE
    padded_total = pl.cdiv(total, tile_align) * tile_align
    if padded_total != total:
        flat = jnp.pad(
            flat, (0, padded_total - total), constant_values=-jnp.inf
        )

    rows = padded_total // LANE                 # multiple of 8
    block_rows = min(MAX_BLOCK_ROWS, rows)      # multiple of 8
    n_blocks = pl.cdiv(rows, block_rows)
    rem = rows % block_rows                     # multiple of 8 (maybe 0)
    x2d = flat.reshape(rows, LANE)

    partials = pl.pallas_call(
        functools.partial(
            _softplus_partial_kernel, block_rows=block_rows, rem=rem
        ),
        out_shape=jax.ShapeDtypeStruct((n_blocks * 8, LANE), jnp.float32),
        grid_spec=pltpu.PrefetchScalarGridSpec(
            num_scalar_prefetch=0,
            grid=(n_blocks,),
            in_specs=[
                pl.BlockSpec((block_rows, LANE), lambda i: (i, 0)),
            ],
            out_specs=pl.BlockSpec((8, LANE), lambda i: (i, 0)),
        ),
        compiler_params=pltpu.CompilerParams(
            # Each grid step writes its own output block: truly parallel, so
            # v7x megacore can shard the grid across both TensorCores.
            dimension_semantics=("parallel",),
        ),
    )(x2d)

    # Tiny final reduce (n_blocks*8*128 f32 values) + mean over the true count.
    return jnp.sum(partials) / jnp.float32(total)


if __name__ == "__main__":
    key = jax.random.PRNGKey(0)
    # Small NCHW-style input (the module is shape-agnostic; mean over all elems).
    x = jax.random.normal(key, (2, 4, 16, 16), dtype=jnp.float32) * 3.0

    loss = oc_softmax_with_loss(x)
    jax.block_until_ready(loss)

    # Reference check against plain JAX softplus mean.
    ref = jnp.mean(jax.nn.softplus(x))
    assert jnp.allclose(loss, ref, rtol=1e-5, atol=1e-5), (loss, ref)

    print("KERNEL_OK")
</pallas_src>

<mosaic_0001>
module attributes {stable_mosaic.version = 11 : i64} {
  func.func @_softplus_partial_kernel(%arg0: i32, %arg1: memref<16x128xf32, #tpu.memory_space<vmem>>, %arg2: memref<8x128xf32, #tpu.memory_space<vmem>>) attributes {dimension_semantics = [#tpu.dimension_semantics<parallel>], iteration_bounds = array<i64: 1>, scalar_prefetch = 0 : i64, scratch_operands = 0 : i64, tpu.core_type = #tpu.core_type<tc>, window_params = [{transform_indices = @transform_0, window_bounds = array<i64: 16, 128>}, {transform_indices = @transform_1, window_bounds = array<i64: 8, 128>}]} {
    %c0 = arith.constant 0 : index
    %c0_0 = arith.constant 0 : index
    %0 = vector.load %arg1[%c0, %c0_0] : memref<16x128xf32, #tpu.memory_space<vmem>>, vector<16x128xf32>
    %cst = arith.constant 0.000000e+00 : f32
    %1 = vector.broadcast %cst : f32 to vector<16x128xf32>
    %2 = arith.maximumf %0, %1 : vector<16x128xf32>
    %3 = math.absf %0 : vector<16x128xf32>
    %cst_1 = arith.constant 0.000000e+00 : f32
    %4 = vector.broadcast %cst_1 : f32 to vector<16x128xf32>
    %5 = arith.subf %4, %3 : vector<16x128xf32>
    %6 = math.exp %5 : vector<16x128xf32>
    %7 = math.log1p %6 : vector<16x128xf32>
    %8 = arith.addf %2, %7 : vector<16x128xf32>
    %9 = vector.shape_cast %8 : vector<16x128xf32> to vector<2x8x128xf32>
    %cst_2 = arith.constant dense<0.000000e+00> : vector<8x128xf32>
    %10 = vector.multi_reduction <add>, %9, %cst_2 [0] : vector<2x8x128xf32> to vector<8x128xf32>
    %c0_3 = arith.constant 0 : index
    %c0_4 = arith.constant 0 : index
    %11 = vector.load %arg2[%c0_3, %c0_4] : memref<8x128xf32, #tpu.memory_space<vmem>>, vector<8x128xf32>
    tpu.vector_store %arg2[%c0_3, %c0_4], %10 {strides = array<i32>} : memref<8x128xf32, #tpu.memory_space<vmem>>, vector<8x128xf32>,
    return
  }
  func.func @transform_0(%arg0: i32) -> (i32, i32) {
    %c0_i32 = arith.constant 0 : i32
    %c0_i32_0 = arith.constant 0 : i32
    return %arg0, %c0_i32 : i32, i32
  }
  func.func @transform_1(%arg0: i32) -> (i32, i32) {
    %c0_i32 = arith.constant 0 : i32
    %c0_i32_0 = arith.constant 0 : i32
    return %arg0, %c0_i32 : i32, i32
  }
}

</mosaic_0001>

<bundles_post_ra>
// kernel: tpu_custom_call.1
= control target key start
LH: loop header
LB: loop body
LE: loop exit
PB: predicated region body
PF: predicated region fallthrough
CT: control target
= control target key end

     0   :  { %6 = vsyncpa [#allocation3], 0  ;;  %s160_s0 = inlined_call_operand.hbm [shape: f32[16,128], index: 0, kind: input, shape index: {}]   ;;  %s161_s1 = inlined_call_operand.hbm [shape: f32[8,128], index: 1, kind: output, shape index: {}]  }
   0x1   :  { %7 = vsyncpa [#allocation4], 0  ;;  %s12_s8 = sshll.u32 %s160_s0, 4  ;;  %s140_s9 = smov [#allocation2]   ;;  %s13_s8 = int_to_ptr.hbm [resolvable:$true] %s12_s8 }
   0x2   :  { %s14_s10 = sshll.u32 %s140_s9, 4  ;;  %s141_s11 = smov 128   ;;  %s15_s10 = int_to_ptr.vmem [resolvable:$true] %s14_s10 }
   0x3   :  { %s142_s12 = smov 8  }
   0x4   :  { %20 = dma.hbm_to_vmem [thread:$0]  %s13_s8, 256, %s15_s10, [#allocation3], %s141_s11, %s141_s11, %s142_s12  }
   0x5   :  { %136 = dma.done.wait [#allocation3], 256  }
   0x6   :  { %137 = vsyncadd [#allocation3], 4294967040  ;;  %v25_v0 = vld [vmem:[#allocation2] sm:$0xff]  ;;  %v26_v1 = vld [vmem:[#allocation2 + $0x8] sm:$0xff]  ;;  %s143_s0 = smov [#allocation5]   ;;  %s66_s16 = sshll.u32 %s161_s1, 4  ;;  %s67_s16 = int_to_ptr.hbm [resolvable:$true] %s66_s16 }
   0x7   :  { %v29_v2 = vand.u32 2147483647, %v25_v0  ;;  %v30_v3 = vand.u32 2147483647, %v26_v1  ;;  %v27_v20 = vmax.f32 %v25_v0, 0.0  ;;  %v28_v23 = vmax.f32 %v26_v1, 0.0 }
   0x8   :  { %s64_s13 = sshll.u32 %s143_s0, 4  ;;  %s65_s13 = int_to_ptr.vmem [resolvable:$true] %s64_s13 }
   0x9   :  { %v31_v4 = vsub.f32 0.0, %v29_v2  ;;  %v32_v5 = vsub.f32 0.0, %v30_v3 }
   0xb   :  { %v33_v6 = vmul.f32 1.442695, %v31_v4  ;;  %v35_v7 = vmul.f32 1.442695, %v32_v5 }
   0xd   :  { %80 = vpow2.f32 %v33_v6 }
   0xe   :  { %82 = vpow2.f32 %v35_v7 }
  0x13   :  { %v81_v8 = vpop.eup %80 }
  0x14   :  { %v83_v9 = vpop.eup %82  ;;  %v37_v10 = vadd.f32 1.0, %v81_v8  ;;  %v40_v11 = vmul.f32 -0.5, %v81_v8  ;;  %v43_v15 = vand.u32 2147483647, %v81_v8 }
  0x15   :  { %v46_v12 = vadd.f32 1.0, %v83_v9  ;;  %v49_v13 = vmul.f32 -0.5, %v83_v9  ;;  %v52_v17 = vand.u32 2147483647, %v83_v9 }
  0x16   :  { %84 = vlog2.f32 %v37_v10  ;;  %v41_v14 = vadd.f32 1.0, %v40_v11  ;;  %vm44_vm0 = vcmp.lt.f32.partialorder %v43_v15, 0.0004427343 }
  0x17   :  { %86 = vlog2.f32 %v46_v12  ;;  %v50_v16 = vadd.f32 1.0, %v49_v13  ;;  %vm53_vm1 = vcmp.lt.f32.partialorder %v52_v17, 0.0004427343 }
  0x18   :  { %v42_v18 = vmul.f32 %v81_v8, %v41_v14 }
  0x19   :  { %v51_v21 = vmul.f32 %v83_v9, %v50_v16 }
  0x1c   :  { %v85_v19 = vpop.eup %84 }
  0x1d   :  { %v87_v22 = vpop.eup %86  ;;  %v39_v24 = vmul.f32 0.6931472, %v85_v19 }
  0x1e   :  { %v48_v25 = vmul.f32 0.6931472, %v87_v22 }
  0x1f   :  { %v45_v26 = vsel %vm44_vm0, %v42_v18, %v39_v24 }
  0x20   :  { %v54_v27 = vsel %vm53_vm1, %v51_v21, %v48_v25  ;;  %v55_v28 = vadd.f32 %v45_v26, %v27_v20 }
  0x21   :  { %v56_v29 = vadd.f32 %v54_v27, %v28_v23 }
  0x23   :  { %v57_v30 = vadd.f32 %v56_v29, %v55_v28 }
  0x25   :  { %58 = vst [vmem:[#allocation5] sm:$0xff] %v57_v30 }
  0x26   :  { %69 = dma.vmem_to_hbm [thread:$0]  %s65_s13, 128, %s67_s16, [#allocation4]  }
  0x27   :  { %138 = dma.done.wait [#allocation4], 128  }
  0x28   :  { %139 = vsyncadd [#allocation4], 4294967168 }
  0x29   :  { %74 = vsyncpa [#allocation3], 1 }
  0x2a   :  { %75 = vsyncpa [#allocation4], 1 }

</bundles_post_ra>
